<compile_context>
chip_gen: v5e
topology: v5e:2x2
jax: 0.10.0
libtpu: 0.0.40
codegen_flags: <defaults>
</compile_context>

<pallas_src>
import functools

import jax
import jax.numpy as jnp
from jax.experimental import pallas as pl
from jax.experimental.pallas import tpu as pltpu


def _round_up(a, b):
    return -(-a // b) * b


def _mlp_kernel(xT_ref, w1T_ref, b1_ref, w2T_ref, b2_ref, w3_ref, b3_ref, o_ref):
    """Fused transposed 3-layer MLP for one lane-tile of rows.

    Shapes (per tile, T = tile width in lanes, H = hidden_dim, D = input_dim):
      xT_ref : (D, T)    w1T_ref: (H, D)   b1_ref: (H, 1)
      w2T_ref: (H, H)    b2_ref : (H, 1)
      w3_ref : (H, 1)    b3_ref : (1, 1)   o_ref : (1, T)
    """
    input_dim = xT_ref.shape[0]
    xT = xT_ref[...]                                  # (D, T), f32, lane-dense
    w1T = w1T_ref[...]                                # (H, D), f32

    # ---- Layer 1 on the VPU: H1^T = W1^T @ X^T via D broadcast FMAs (K=3). ----
    h1 = b1_ref[...] + w1T[:, 0:1] * xT[0:1, :]       # (H,1)*(1,T) -> (H,T)
    for d in range(1, input_dim):
        h1 = h1 + w1T[:, d : d + 1] * xT[d : d + 1, :]
    # Fused ReLU + cast straight into the layer-2 operand dtype (bf16 on TPU):
    # avoids keeping a second f32 (H, T) copy of h1 live.
    h1 = jnp.maximum(h1, 0.0).astype(w2T_ref.dtype)

    # ---- Layer 2 on the MXU: the only real 128x128 matmul (f32 accumulation). ----
    h2 = (
        jnp.dot(w2T_ref[...], h1, preferred_element_type=jnp.float32)
        + b2_ref[...]
    )
    h2 = jnp.maximum(h2, 0.0)                         # (H, T)

    # ---- Layer 3 on VPU + XLU: out^T = sum_f w3[f] * H2^T[f, :] + b3. ----
    out = jnp.sum(h2 * w3_ref[...], axis=0, keepdims=True) + b3_ref[...]  # (1, T)
    o_ref[...] = out.astype(o_ref.dtype)


@functools.partial(jax.jit, static_argnames=("tile_rows", "layer2_dtype"))
def _bpp_forward(x, params, *, tile_rows, layer2_dtype):
    batch, max_len, input_dim = x.shape
    hidden_dim = params["w1"].shape[1]
    output_dim = params["w3"].shape[1]

    n_rows = batch * max_len
    n_rows_padded = _round_up(n_rows, 256)

    # Lane tile: large (amortizes ~0.35us per grid step), multiple of 256
    # (fills the 256-wide MXU N dim on v6e/v7x; >=128 for v5e), never larger
    # than the (padded) row count, and capped so the 1-D parallel grid has at
    # least 2 steps when there is enough work (v7x megacore sharding).
    tile = _round_up(max(256, min(int(tile_rows), n_rows_padded)), 256)
    if n_rows_padded >= 512:
        tile = min(tile, _round_up(-(-n_rows_padded // 2), 256))

    pad_rows = (-n_rows) % tile
    # Single fused pad-then-transpose expression (one HBM pass before the kernel).
    xT = jnp.pad(x.reshape(n_rows, input_dim), ((0, pad_rows), (0, 0))).T
    n_padded = n_rows + pad_rows
    grid = (n_padded // tile,)

    # Transposed parameters (tiny one-time cost), resident in VMEM across the grid.
    w1T = params["w1"].T                                   # (hid, in)
    b1 = params["b1"].reshape(hidden_dim, 1)
    w2T = params["w2"].T.astype(layer2_dtype)              # (hid, hid)
    b2 = params["b2"].reshape(hidden_dim, 1)
    w3 = params["w3"].reshape(hidden_dim, output_dim)      # (hid, 1)
    b3 = params["b3"].reshape(1, output_dim)               # (1, 1)

    flops = 2 * n_padded * hidden_dim * (input_dim + hidden_dim + output_dim)
    bytes_accessed = (
        xT.size * 4
        + n_padded * 4
        + (w1T.size + b1.size + b2.size + w3.size + b3.size) * 4
        + w2T.size * w2T.dtype.itemsize
    )
    cost = pl.CostEstimate(
        flops=flops, transcendentals=0, bytes_accessed=bytes_accessed
    )

    # Scoped-VMEM budget: enough for the big lane tile (v5e default is 16 MiB),
    # kept under v7x's 64 MiB-per-TC physical VMEM with headroom.
    est = 4 * hidden_dim * tile * 4 + 4 * (input_dim + 1) * tile * 4 + (4 << 20)
    vmem_limit_bytes = int(min(max(est, 32 << 20), 56 << 20))

    outT = pl.pallas_call(
        _mlp_kernel,
        out_shape=jax.ShapeDtypeStruct((1, n_padded), jnp.float32),
        grid_spec=pltpu.PrefetchScalarGridSpec(
            num_scalar_prefetch=0,
            grid=grid,
            in_specs=[
                # activations: lane-tiled
                pl.BlockSpec((input_dim, tile), lambda i: (0, i)),
                # parameters: full blocks, resident in VMEM across the grid
                pl.BlockSpec((hidden_dim, input_dim), lambda i: (0, 0)),
                pl.BlockSpec((hidden_dim, 1), lambda i: (0, 0)),
                pl.BlockSpec((hidden_dim, hidden_dim), lambda i: (0, 0)),
                pl.BlockSpec((hidden_dim, 1), lambda i: (0, 0)),
                pl.BlockSpec((hidden_dim, output_dim), lambda i: (0, 0)),
                pl.BlockSpec((1, output_dim), lambda i: (0, 0)),
            ],
            out_specs=pl.BlockSpec((1, tile), lambda i: (0, i)),
        ),
        compiler_params=pltpu.CompilerParams(
            dimension_semantics=("parallel",),
            vmem_limit_bytes=vmem_limit_bytes,
        ),
        cost_estimate=cost,
    )(xT, w1T, b1, w2T, b2, w3, b3)

    scores = outT[0, :n_rows].reshape(batch, max_len)
    return scores


def bpp_model_forward(x, params, *, tile_rows=8192, layer2_dtype="auto"):
    """Pallas implementation of BPPModel.forward.

    Args:
      x: (batch, max_len, input_dim) float32.
      params: dict with w1 (in,hid), b1 (hid,), w2 (hid,hid), b2 (hid,),
              w3 (hid,out=1), b3 (out,).
      tile_rows: rows (== lanes in the transposed layout) per grid step.
      layer2_dtype: operand dtype for the dominant 128x128 matmul.  "auto"
        picks bf16 on a real TPU backend (f32 accumulation) and f32 elsewhere.
    Returns:
      scores: (batch, max_len) float32.
    """
    if layer2_dtype == "auto":
        layer2_dtype = (
            jnp.bfloat16 if jax.default_backend() == "tpu" else jnp.float32
        )
    return _bpp_forward(x, params, tile_rows=int(tile_rows), layer2_dtype=layer2_dtype)


def init_params(key, input_dim=3, hidden_dim=128, output_dim=1):
    """Deterministic parameter init (PyTorch-style uniform fan-in bounds)."""
    k1, k2, k3, k4, k5, k6 = jax.random.split(key, 6)

    def uniform(k, shape, fan_in):
        bound = 1.0 / jnp.sqrt(fan_in)
        return jax.random.uniform(k, shape, jnp.float32, -bound, bound)

    return {
        "w1": uniform(k1, (input_dim, hidden_dim), input_dim),
        "b1": uniform(k2, (hidden_dim,), input_dim),
        "w2": uniform(k3, (hidden_dim, hidden_dim), hidden_dim),
        "b2": uniform(k4, (hidden_dim,), hidden_dim),
        "w3": uniform(k5, (hidden_dim, output_dim), hidden_dim),
        "b3": uniform(k6, (output_dim,), hidden_dim),
    }


def _reference_forward(x, params):
    """Pure-JAX reference matching the PyTorch semantics."""
    b, l, d = x.shape
    xf = x.reshape(-1, d)
    h1 = jnp.maximum(xf @ params["w1"] + params["b1"], 0.0)
    h2 = jnp.maximum(h1 @ params["w2"] + params["b2"], 0.0)
    out = h2 @ params["w3"] + params["b3"]
    return out.reshape(b, l)


if __name__ == "__main__":
    key = jax.random.PRNGKey(0)
    pkey, xkey = jax.random.split(key)

    input_dim, hidden_dim, output_dim = 3, 128, 1
    batch, max_len = 2, 8

    params = init_params(pkey, input_dim, hidden_dim, output_dim)
    x = jax.random.normal(xkey, (batch, max_len, input_dim), dtype=jnp.float32)

    ref = _reference_forward(x, params)
    on_tpu = jax.default_backend() == "tpu"

    # Explicit f32 path: tight check against the pure-JAX reference.
    scores_f32 = jax.block_until_ready(
        bpp_model_forward(x, params, layer2_dtype=jnp.float32)
    )
    assert scores_f32.shape == (batch, max_len)
    assert jnp.allclose(scores_f32, ref, atol=1e-4, rtol=1e-4), "f32 mismatch vs reference"

    # Default ("auto") path: bf16 layer-2 operands (f32 accumulation) on TPU,
    # f32 on non-TPU backends.  Relaxed tolerance only when bf16 is in play.
    scores = jax.block_until_ready(bpp_model_forward(x, params))
    assert scores.shape == (batch, max_len)
    tol = 5e-2 if on_tpu else 1e-4
    assert jnp.allclose(scores, ref, atol=tol, rtol=tol), "auto-path mismatch vs reference"

    print("KERNEL_OK")
</pallas_src>

<mosaic_0001>
module attributes {stable_mosaic.version = 11 : i64} {
  func.func @_mlp_kernel(%arg0: i32, %arg1: memref<3x256xf32, #tpu.memory_space<vmem>>, %arg2: memref<128x3xf32, #tpu.memory_space<vmem>>, %arg3: memref<128x1xf32, #tpu.memory_space<vmem>>, %arg4: memref<128x128xf32, #tpu.memory_space<vmem>>, %arg5: memref<128x1xf32, #tpu.memory_space<vmem>>, %arg6: memref<128x1xf32, #tpu.memory_space<vmem>>, %arg7: memref<1x1xf32, #tpu.memory_space<vmem>>, %arg8: memref<1x256xf32, #tpu.memory_space<vmem>>) attributes {dimension_semantics = [#tpu.dimension_semantics<parallel>], iteration_bounds = array<i64: 1>, scalar_prefetch = 0 : i64, scratch_operands = 0 : i64, tpu.core_type = #tpu.core_type<tc>, window_params = [{transform_indices = @transform_0, window_bounds = array<i64: 3, 256>}, {pipeline_mode = #tpu.pipeline_mode<synchronous>, transform_indices = @transform_1, window_bounds = array<i64: 128, 3>}, {pipeline_mode = #tpu.pipeline_mode<synchronous>, transform_indices = @transform_2, window_bounds = array<i64: 128, 1>}, {pipeline_mode = #tpu.pipeline_mode<synchronous>, transform_indices = @transform_3, window_bounds = array<i64: 128, 128>}, {pipeline_mode = #tpu.pipeline_mode<synchronous>, transform_indices = @transform_4, window_bounds = array<i64: 128, 1>}, {pipeline_mode = #tpu.pipeline_mode<synchronous>, transform_indices = @transform_5, window_bounds = array<i64: 128, 1>}, {pipeline_mode = #tpu.pipeline_mode<synchronous>, transform_indices = @transform_6, window_bounds = array<i64: 1, 1>}, {transform_indices = @transform_7, window_bounds = array<i64: 1, 256>}]} {
    %c0 = arith.constant 0 : index
    %c0_0 = arith.constant 0 : index
    %0 = vector.load %arg1[%c0, %c0_0] : memref<3x256xf32, #tpu.memory_space<vmem>>, vector<3x256xf32>
    %c0_1 = arith.constant 0 : index
    %c0_2 = arith.constant 0 : index
    %1 = vector.load %arg2[%c0_1, %c0_2] : memref<128x3xf32, #tpu.memory_space<vmem>>, vector<128x3xf32>
    %c0_3 = arith.constant 0 : index
    %c0_4 = arith.constant 0 : index
    %2 = vector.load %arg3[%c0_3, %c0_4] : memref<128x1xf32, #tpu.memory_space<vmem>>, vector<128x1xf32>
    %3 = vector.extract_strided_slice %1 {offsets = [0, 0], sizes = [128, 1], strides = [1, 1]} : vector<128x3xf32> to vector<128x1xf32>
    %4 = vector.extract_strided_slice %0 {offsets = [0, 0], sizes = [1, 256], strides = [1, 1]} : vector<3x256xf32> to vector<1x256xf32>
    %5 = vector.broadcast %3 : vector<128x1xf32> to vector<128x256xf32>
    %6 = vector.broadcast %4 : vector<1x256xf32> to vector<128x256xf32>
    %7 = arith.mulf %5, %6 : vector<128x256xf32>
    %8 = vector.broadcast %2 : vector<128x1xf32> to vector<128x256xf32>
    %9 = arith.addf %8, %7 : vector<128x256xf32>
    %10 = vector.extract_strided_slice %1 {offsets = [0, 1], sizes = [128, 1], strides = [1, 1]} : vector<128x3xf32> to vector<128x1xf32>
    %11 = vector.extract_strided_slice %0 {offsets = [1, 0], sizes = [1, 256], strides = [1, 1]} : vector<3x256xf32> to vector<1x256xf32>
    %12 = vector.broadcast %10 : vector<128x1xf32> to vector<128x256xf32>
    %13 = vector.broadcast %11 : vector<1x256xf32> to vector<128x256xf32>
    %14 = arith.mulf %12, %13 : vector<128x256xf32>
    %15 = arith.addf %9, %14 : vector<128x256xf32>
    %16 = vector.extract_strided_slice %1 {offsets = [0, 2], sizes = [128, 1], strides = [1, 1]} : vector<128x3xf32> to vector<128x1xf32>
    %17 = vector.extract_strided_slice %0 {offsets = [2, 0], sizes = [1, 256], strides = [1, 1]} : vector<3x256xf32> to vector<1x256xf32>
    %18 = vector.broadcast %16 : vector<128x1xf32> to vector<128x256xf32>
    %19 = vector.broadcast %17 : vector<1x256xf32> to vector<128x256xf32>
    %20 = arith.mulf %18, %19 : vector<128x256xf32>
    %21 = arith.addf %15, %20 : vector<128x256xf32>
    %cst = arith.constant 0.000000e+00 : f32
    %22 = vector.broadcast %cst : f32 to vector<128x256xf32>
    %23 = arith.maximumf %21, %22 : vector<128x256xf32>
    %c0_5 = arith.constant 0 : index
    %c0_6 = arith.constant 0 : index
    %24 = vector.load %arg4[%c0_5, %c0_6] : memref<128x128xf32, #tpu.memory_space<vmem>>, vector<128x128xf32>
    %cst_7 = arith.constant dense<0.000000e+00> : vector<128x256xf32>
    %25 = tpu.matmul %24, %23, %cst_7 {dimension_numbers = #tpu.dot_dimension_numbers<[1], [0], [0], [1], [0, 0, 1, 1], [], []>} : vector<128x128xf32>, vector<128x256xf32>, vector<128x256xf32> -> vector<128x256xf32>
    %c0_8 = arith.constant 0 : index
    %c0_9 = arith.constant 0 : index
    %26 = vector.load %arg5[%c0_8, %c0_9] : memref<128x1xf32, #tpu.memory_space<vmem>>, vector<128x1xf32>
    %27 = vector.broadcast %26 : vector<128x1xf32> to vector<128x256xf32>
    %28 = arith.addf %25, %27 : vector<128x256xf32>
    %cst_10 = arith.constant 0.000000e+00 : f32
    %29 = vector.broadcast %cst_10 : f32 to vector<128x256xf32>
    %30 = arith.maximumf %28, %29 : vector<128x256xf32>
    %c0_11 = arith.constant 0 : index
    %c0_12 = arith.constant 0 : index
    %31 = vector.load %arg6[%c0_11, %c0_12] : memref<128x1xf32, #tpu.memory_space<vmem>>, vector<128x1xf32>
    %32 = vector.broadcast %31 : vector<128x1xf32> to vector<128x256xf32>
    %33 = arith.mulf %30, %32 : vector<128x256xf32>
    %cst_13 = arith.constant dense<0.000000e+00> : vector<256xf32>
    %34 = vector.multi_reduction <add>, %33, %cst_13 [0] : vector<128x256xf32> to vector<256xf32>
    %35 = vector.shape_cast %34 : vector<256xf32> to vector<1x256xf32>
    %c0_14 = arith.constant 0 : index
    %c0_15 = arith.constant 0 : index
    %36 = vector.load %arg7[%c0_14, %c0_15] : memref<1x1xf32, #tpu.memory_space<vmem>>, vector<1x1xf32>
    %37 = vector.broadcast %36 : vector<1x1xf32> to vector<1x256xf32>
    %38 = arith.addf %35, %37 : vector<1x256xf32>
    %c0_16 = arith.constant 0 : index
    %c0_17 = arith.constant 0 : index
    %39 = vector.load %arg8[%c0_16, %c0_17] : memref<1x256xf32, #tpu.memory_space<vmem>>, vector<1x256xf32>
    tpu.vector_store %arg8[%c0_16, %c0_17], %38 {strides = array<i32>} : memref<1x256xf32, #tpu.memory_space<vmem>>, vector<1x256xf32>,
    return
  }
  func.func @transform_0(%arg0: i32) -> (i32, i32) {
    %c0_i32 = arith.constant 0 : i32
    %c0_i32_0 = arith.constant 0 : i32
    return %c0_i32, %arg0 : i32, i32
  }
  func.func @transform_1(%arg0: i32) -> (i32, i32) {
    %c0_i32 = arith.constant 0 : i32
    %c0_i32_0 = arith.constant 0 : i32
    %c0_i32_1 = arith.constant 0 : i32
    return %c0_i32, %c0_i32_0 : i32, i32
  }
  func.func @transform_2(%arg0: i32) -> (i32, i32) {
    %c0_i32 = arith.constant 0 : i32
    %c0_i32_0 = arith.constant 0 : i32
    %c0_i32_1 = arith.constant 0 : i32
    return %c0_i32, %c0_i32_0 : i32, i32
  }
  func.func @transform_3(%arg0: i32) -> (i32, i32) {
    %c0_i32 = arith.constant 0 : i32
    %c0_i32_0 = arith.constant 0 : i32
    %c0_i32_1 = arith.constant 0 : i32
    return %c0_i32, %c0_i32_0 : i32, i32
  }
  func.func @transform_4(%arg0: i32) -> (i32, i32) {
    %c0_i32 = arith.constant 0 : i32
    %c0_i32_0 = arith.constant 0 : i32
    %c0_i32_1 = arith.constant 0 : i32
    return %c0_i32, %c0_i32_0 : i32, i32
  }
  func.func @transform_5(%arg0: i32) -> (i32, i32) {
    %c0_i32 = arith.constant 0 : i32
    %c0_i32_0 = arith.constant 0 : i32
    %c0_i32_1 = arith.constant 0 : i32
    return %c0_i32, %c0_i32_0 : i32, i32
  }
  func.func @transform_6(%arg0: i32) -> (i32, i32) {
    %c0_i32 = arith.constant 0 : i32
    %c0_i32_0 = arith.constant 0 : i32
    %c0_i32_1 = arith.constant 0 : i32
    return %c0_i32, %c0_i32_0 : i32, i32
  }
  func.func @transform_7(%arg0: i32) -> (i32, i32) {
    %c0_i32 = arith.constant 0 : i32
    %c0_i32_0 = arith.constant 0 : i32
    return %c0_i32, %arg0 : i32, i32
  }
}

</mosaic_0001>

<bundles_post_ra>
// kernel: squeeze.1
= control target key start
LH: loop header
LB: loop body
LE: loop exit
PB: predicated region body
PF: predicated region fallthrough
CT: control target
= control target key end

     0   :  { %s80_s0 = inlined_call_operand.vmem [shape: f32[16], index: 0, kind: input, shape index: {}]   ;;  %s81_s1 = inlined_call_operand.hbm [shape: f32[2,8], index: 1, kind: output, shape index: {}]  }
   0x1   :  { %v5_v0 = vld [vmem:[%s80_s0] sm:$0x1] }
   0x2   :  { %2 = vsyncpa [#allocation1], 0  ;;  %6 = vst [vmem:[#allocation3] sm:$0x1] %v5_v0  ;;  %vm8_vm0 = vcmask 64512   ;;  %s62_s0 = smov 120  }
   0x3   :  { %s63_s8 = smov [#allocation0]   ;;  %s27_s1 = sshll.u32 %s81_s1, 4  ;;  %s28_s1 = int_to_ptr.hbm [resolvable:$true] %s27_s1 }
   0x4   :  { %s25_s9 = sshll.u32 %s63_s8, 4  ;;  %s26_s9 = int_to_ptr.vmem [resolvable:$true] %s25_s9 }
   0x9   :  { %v10_v1 = vld [vmem:[#allocation3] sm:$0x1]  }
   0xa   :  { %v7_v2 = vld [vmem:[#allocation3] sm:$0x1]   ;;  %11 = vrot.lane.b32.xlu0 %v10_v1, %s62_s0 }
   0xb   :  { %9 = vst.msk [vmem:[#allocation2] sm:$0x1] %vm8_vm0, %v7_v2  }
  0x7c   :  { %v12_v3 = vpop.permute.xlu0 %11  }
  0x7d   :  { %15 = vst.msk [vmem:[#allocation2 + $0x1] sm:$0x1] %vm8_vm0, %v12_v3  }
  0x84   :  { %v18_v4 = vld [vmem:[#allocation2] sm:$0x3] }
  0x85   :  { %21 = vst [vmem:[#allocation0] sm:$0x3] %v18_v4 }
  0x86   :  { %30 = dma.vmem_to_hbm [thread:$0]  %s26_s9, 32, %s28_s1, [#allocation1]  }
  0x87   :  { %60 = dma.done.wait [#allocation1], 32  }
  0x88   :  { %61 = vsyncadd [#allocation1], 4294967264 }
  0x89   :  { %33 = vsyncpa [#allocation1], 1 }

// kernel: _bpp_forward.1
= control target key start
LH: loop header
LB: loop body
LE: loop exit
PB: predicated region body
PF: predicated region fallthrough
CT: control target
= control target key end

     0   :  { %v1107_v0 = vmov 0   ;;  %v1108_v33 = vmov 1   ;;  %v1109_v50 = vmov 2   ;;  %vm1048_vm0 = vcmask 1040384   ;;  %s1850_s1 = inlined_call_operand.vmem [shape: f32[128,3], index: 1, kind: input, shape index: {}]   ;;  %s1851_s2 = inlined_call_operand.vmem [shape: f32[128,1], index: 2, kind: input, shape index: {}]   ;;  %s1852_s0 = inlined_call_operand.vmem [shape: f32[3,256], index: 0, kind: input, shape index: {}]   ;;  %s1853_s4 = inlined_call_operand.vmem [shape: f32[128,1], index: 4, kind: input, shape index: {}]   ;;  %s1854_s5 = inlined_call_operand.vmem [shape: f32[128,1], index: 5, kind: input, shape index: {}]   ;;  %s1855_s6 = inlined_call_operand.<no memory space> [shape: f32[1,1], index: 6, kind: input, shape index: {}]   ;;  %s1856_s3 = inlined_call_operand.vmem [shape: f32[128,128], index: 3, kind: input, shape index: {}]   ;;  %s1857_s7 = inlined_call_operand.vmem [shape: f32[1,256], index: 7, kind: output, shape index: {}]  }
   0x1   :  { %1097 = vset.pattern.permute.xlu2 %v1107_v0  ;;  %1096 = vset.pattern.permute.xlu1 %v1107_v0  ;;  %v1155_v1 = vld [vmem:[%s1850_s1 + $0x20] sm:$0xff]  ;;  %v1160_v2 = vld [vmem:[%s1850_s1 + $0x10] sm:$0xff]  ;;  %v1174_v4 = vld [vmem:[%s1850_s1 + $0x28] sm:$0xff] }
   0x2   :  { %v1165_v3 = vld [vmem:[%s1850_s1] sm:$0xff]  ;;  %1095 = vset.pattern.permute.xlu0 %v1107_v0  ;;  %83 = vperm.xlu2 %1097, %v1155_v1   ;;  %v1179_v5 = vld [vmem:[%s1850_s1 + $0x18] sm:$0xff]  ;;  %v1184_v6 = vld [vmem:[%s1850_s1 + $0x8] sm:$0xff] }
   0x3   :  { %73 = vperm.xlu1 %1096, %v1160_v2   ;;  %63 = vperm.xlu0 %1095, %v1165_v3   ;;  %v1192_v7 = vld [vmem:[%s1850_s1 + $0x40] sm:$0xff]  ;;  %v1197_v8 = vld [vmem:[%s1850_s1 + $0x38] sm:$0xff]  ;;  %v1202_v9 = vld [vmem:[%s1850_s1 + $0x30] sm:$0xff] }
   0x4   :  { %v1210_v10 = vld [vmem:[%s1850_s1 + $0x58] sm:$0xff]  ;;  %v1215_v11 = vld [vmem:[%s1850_s1 + $0x50] sm:$0xff]  ;;  %v1220_v12 = vld [vmem:[%s1850_s1 + $0x48] sm:$0xff] }
   0x5   :  { %v1228_v13 = vld [vmem:[%s1850_s1 + $0x70] sm:$0xff]  ;;  %v1233_v14 = vld [vmem:[%s1850_s1 + $0x68] sm:$0xff]  ;;  %v1238_v15 = vld [vmem:[%s1850_s1 + $0x60] sm:$0xff] }
   0x6   :  { %v46_v16 = vld [vmem:[%s1851_s2 + $0x8] sm:$0xff]  ;;  %v45_v17 = vld [vmem:[%s1851_s2] sm:$0xff]  ;;  %v1252_v18 = vld [vmem:[%s1850_s1 + $0x78] sm:$0xff] }
   0x7   :  { %v49_v19 = vld [vmem:[%s1851_s2 + $0x20] sm:$0xff]  ;;  %v48_v20 = vld [vmem:[%s1851_s2 + $0x18] sm:$0xff]  ;;  %v47_v21 = vld [vmem:[%s1851_s2 + $0x10] sm:$0xff] }
   0x8   :  { %v52_v22 = vld [vmem:[%s1851_s2 + $0x38] sm:$0xff]  ;;  %v51_v23 = vld [vmem:[%s1851_s2 + $0x30] sm:$0xff]  ;;  %v50_v24 = vld [vmem:[%s1851_s2 + $0x28] sm:$0xff] }
   0x9   :  { %v55_v25 = vld [vmem:[%s1851_s2 + $0x50] sm:$0xff]  ;;  %v54_v26 = vld [vmem:[%s1851_s2 + $0x48] sm:$0xff]  ;;  %v53_v27 = vld [vmem:[%s1851_s2 + $0x40] sm:$0xff] }
   0xa   :  { %88 = vperm.xlu2 %1097, %v1174_v4   ;;  %v58_v28 = vld [vmem:[%s1851_s2 + $0x68] sm:$0xff]  ;;  %v57_v29 = vld [vmem:[%s1851_s2 + $0x60] sm:$0xff]  ;;  %v56_v30 = vld [vmem:[%s1851_s2 + $0x58] sm:$0xff] }
   0xb   :  { %78 = vperm.xlu1 %1096, %v1179_v5   ;;  %68 = vperm.xlu0 %1095, %v1184_v6   ;;  %v60_v31 = vld [vmem:[%s1851_s2 + $0x78] sm:$0xff]  ;;  %v59_v32 = vld [vmem:[%s1851_s2 + $0x70] sm:$0xff]  ;;  %v1319_v40 = vld [vmem:[%s1852_s0] sm:$0x77] }
   0xc   :  { %v142_v41 = vperm.slane %v1319_v40, 0  ;;  %v143_v42 = vperm.slane %v1319_v40, 4 }
   0xe   :  { %v1328_v46 = vperm.slane %v142_v41, 0  ;;  %v1330_v47 = vperm.slane %v143_v42, 0 }
  0x12   :  { %103 = vperm.xlu2 %1097, %v1192_v7  }
  0x13   :  { %98 = vperm.xlu1 %1096, %v1197_v8   ;;  %93 = vperm.xlu0 %1095, %v1202_v9  }
  0x1a   :  { %118 = vperm.xlu2 %1097, %v1210_v10  }
  0x1b   :  { %113 = vperm.xlu1 %1096, %v1215_v11   ;;  %108 = vperm.xlu0 %1095, %v1220_v12  }
  0x22   :  { %133 = vperm.xlu2 %1097, %v1228_v13  }
  0x23   :  { %128 = vperm.xlu1 %1096, %v1233_v14   ;;  %123 = vperm.xlu0 %1095, %v1238_v15  }
  0x2a   :  { %187 = vperm.xlu2 %1097, %v46_v16  }
  0x2b   :  { %182 = vperm.xlu1 %1096, %v45_v17   ;;  %138 = vperm.xlu0 %1095, %v1252_v18  }
  0x32   :  { %202 = vperm.xlu2 %1097, %v49_v19  }
  0x33   :  { %197 = vperm.xlu1 %1096, %v48_v20   ;;  %192 = vperm.xlu0 %1095, %v47_v21  }
  0x3a   :  { %217 = vperm.xlu2 %1097, %v52_v22  }
  0x3b   :  { %212 = vperm.xlu1 %1096, %v51_v23   ;;  %207 = vperm.xlu0 %1095, %v50_v24  }
  0x42   :  { %232 = vperm.xlu2 %1097, %v55_v25  }
  0x43   :  { %227 = vperm.xlu1 %1096, %v54_v26   ;;  %222 = vperm.xlu0 %1095, %v53_v27  }
  0x4a   :  { %247 = vperm.xlu2 %1097, %v58_v28  }
  0x4b   :  { %242 = vperm.xlu1 %1096, %v57_v29   ;;  %237 = vperm.xlu0 %1095, %v56_v30  }
  0x52   :  { %1098 = vset.pattern.permute.xlu2 %v1108_v33 }
  0x53   :  { %257 = vperm.xlu1 %1096, %v60_v31   ;;  %252 = vperm.xlu0 %1095, %v59_v32  }
  0x54   :  { %293 = vperm.xlu2 %1098, %v1165_v3  }
  0x5b   :  { %1100 = vset.pattern.permute.xlu1 %v1108_v33  ;;  %1099 = vset.pattern.permute.xlu0 %v1108_v33  ;;  %v356_v33 = vperm.slane %v1319_v40, 1 }
  0x5c   :  { %301 = vperm.xlu1 %1100, %v1160_v2   ;;  %305 = vperm.xlu2 %1098, %v1179_v5   ;;  %v84_v34 = vpop.permute.xlu2 %83 }
  0x5d   :  { %297 = vperm.xlu0 %1099, %v1184_v6   ;;  %v156_v56 = vmul.f32 %v1328_v46, %v84_v34  ;;  %v157_v57 = vmul.f32 %v1330_v47, %v84_v34  ;;  %v357_v34 = vperm.slane %v1319_v40, 5 }
  0x64   :  { %309 = vperm.xlu1 %1100, %v1155_v1   ;;  %313 = vperm.xlu2 %1098, %v1174_v4   ;;  %v1303_v35 = vpop.permute.xlu2 %88 }
  0x65   :  { %317 = vperm.xlu0 %1099, %v1202_v9  }
  0x6c   :  { %321 = vperm.xlu1 %1100, %v1197_v8   ;;  %325 = vperm.xlu2 %1098, %v1192_v7   ;;  %v1308_v36 = vpop.permute.xlu2 %103 }
  0x6d   :  { %329 = vperm.xlu0 %1099, %v1220_v12  }
  0x74   :  { %333 = vperm.xlu1 %1100, %v1215_v11   ;;  %337 = vperm.xlu2 %1098, %v1210_v10   ;;  %v1313_v37 = vpop.permute.xlu2 %118 }
  0x75   :  { %341 = vperm.xlu0 %1099, %v1238_v15   ;;  %v74_v38 = vpop.permute.xlu1 %73  ;;  %v64_v39 = vpop.permute.xlu0 %63 }
  0x76   :  { %v148_v19 = vmul.f32 %v1328_v46, %v64_v39  ;;  %v149_v20 = vmul.f32 %v1330_v47, %v64_v39  ;;  %v152_v25 = vmul.f32 %v1328_v46, %v74_v38  ;;  %v153_v26 = vmul.f32 %v1330_v47, %v74_v38 }
  0x77   :  { %v1393_v38 = vperm.slane %v356_v33, 1  ;;  %v1395_v39 = vperm.slane %v357_v34, 1  ;;  %v614_v33 = vld [vmem:[%s1853_s4 + $0x30] sm:$0xff] }
  0x7c   :  { %345 = vperm.xlu1 %1100, %v1233_v14   ;;  %349 = vperm.xlu2 %1098, %v1228_v13   ;;  %v1325_v43 = vpop.permute.xlu2 %133 }
  0x7d   :  { %353 = vperm.xlu0 %1099, %v1252_v18   ;;  %v79_v44 = vpop.permute.xlu1 %78  ;;  %v69_v45 = vpop.permute.xlu0 %68 }
  0x7e   :  { %v150_v48 = vmul.f32 %v1328_v46, %v69_v45  ;;  %v151_v49 = vmul.f32 %v1330_v47, %v69_v45  ;;  %v154_v27 = vmul.f32 %v1328_v46, %v79_v44  ;;  %v155_v28 = vmul.f32 %v1330_v47, %v79_v44 }
  0x84   :  { %1101 = vset.pattern.permute.xlu1 %v1109_v50  ;;  %1102 = vset.pattern.permute.xlu2 %v1109_v50  ;;  %v188_v51 = vpop.permute.xlu2 %187 }
  0x85   :  { %1103 = vset.pattern.permute.xlu0 %v1109_v50  ;;  %v1334_v52 = vadd.f32 %v188_v51, %v150_v48  ;;  %v1336_v53 = vadd.f32 %v188_v51, %v151_v49  ;;  %487 = vperm.xlu1 %1101, %v1252_v18   ;;  %v99_v54 = vpop.permute.xlu1 %98  ;;  %v94_v55 = vpop.permute.xlu0 %93 }
  0x86   :  { %483 = vperm.xlu2 %1102, %v1228_v13   ;;  %479 = vperm.xlu0 %1103, %v1233_v14   ;;  %v162_v63 = vmul.f32 %v1328_v46, %v99_v54  ;;  %v163_v13 = vmul.f32 %v1330_v47, %v99_v54  ;;  %v160_v41 = vmul.f32 %v1328_v46, %v94_v55 }
  0x87   :  { %v161_v42 = vmul.f32 %v1330_v47, %v94_v55 }
  0x8c   :  { %v203_v58 = vpop.permute.xlu2 %202 }
  0x8d   :  { %v1343_v59 = vadd.f32 %v203_v58, %v156_v56  ;;  %v1345_v60 = vadd.f32 %v203_v58, %v157_v57  ;;  %475 = vperm.xlu1 %1101, %v1238_v15   ;;  %v114_v61 = vpop.permute.xlu1 %113  ;;  %v1348_v62 = vpop.permute.xlu0 %108  ;;  %v165_v58 = vmul.f32 %v1330_v47, %v1308_v36 }
  0x8e   :  { %471 = vperm.xlu2 %1102, %v1210_v10   ;;  %459 = vperm.xlu0 %1103, %v1192_v7   ;;  %v168_v7 = vmul.f32 %v1328_v46, %v114_v61  ;;  %v169_v10 = vmul.f32 %v1330_v47, %v114_v61  ;;  %v167_v61 = vmul.f32 %v1330_v47, %v1348_v62 }
  0x94   :  { %v218_v14 = vpop.permute.xlu2 %217 }
  0x95   :  { %v1354_v16 = vadd.f32 %v218_v14, %v162_v63  ;;  %v1356_v17 = vadd.f32 %v218_v14, %v163_v13  ;;  %467 = vperm.xlu1 %1101, %v1215_v11   ;;  %v1359_v18 = vpop.permute.xlu1 %128  ;;  %v1361_v15 = vpop.permute.xlu0 %123 }
  0x96   :  { %463 = vperm.xlu2 %1102, %v1220_v12   ;;  %447 = vperm.xlu0 %1103, %v1174_v4  }
  0x9c   :  { %v233_v21 = vpop.permute.xlu2 %232 }
  0x9d   :  { %v1369_v22 = vadd.f32 %v233_v21, %v168_v7  ;;  %v1371_v11 = vadd.f32 %v233_v21, %v169_v10  ;;  %455 = vperm.xlu1 %1101, %v1197_v8   ;;  %v183_v23 = vpop.permute.xlu1 %182  ;;  %v1374_v24 = vpop.permute.xlu0 %138 }
  0x9e   :  { %v260_v12 = vadd.f32 %v183_v23, %v148_v19  ;;  %v261_v4 = vadd.f32 %v183_v23, %v149_v20  ;;  %451 = vperm.xlu2 %1102, %v1202_v9   ;;  %435 = vperm.xlu0 %1103, %v1160_v2  }
  0xa4   :  { %v1382_v29 = vpop.permute.xlu2 %247 }
  0xa5   :  { %443 = vperm.xlu1 %1101, %v1155_v1   ;;  %v198_v8 = vpop.permute.xlu1 %197  ;;  %v193_v30 = vpop.permute.xlu0 %192  ;;  %v158_v1 = vmul.f32 %v1328_v46, %v1303_v35 }
  0xa6   :  { %v266_v31 = vadd.f32 %v198_v8, %v154_v27  ;;  %v267_v32 = vadd.f32 %v198_v8, %v155_v28  ;;  %439 = vperm.xlu2 %1102, %v1179_v5   ;;  %v1386_v9 = vadd.f32 %v193_v30, %v152_v25  ;;  %v1388_v2 = vadd.f32 %v193_v30, %v153_v26  ;;  %v609_v25 = vld [vmem:[%s1853_s4 + $0x8] sm:$0xff]  ;;  %v611_v8 = vld [vmem:[%s1853_s4 + $0x18] sm:$0xff] }
  0xa7   :  { %1104 = vset.pattern.permute.xlu0 %v1107_v0  ;;  %v159_v5 = vmul.f32 %v1330_v47, %v1303_v35  ;;  %v613_v30 = vld [vmem:[%s1853_s4 + $0x28] sm:$0xff] }
  0xad   :  { %v213_v44 = vpop.permute.xlu1 %212  ;;  %431 = vperm.xlu1 %1101, %v1184_v6   ;;  %v208_v45 = vpop.permute.xlu0 %207  ;;  %v164_v6 = vmul.f32 %v1328_v46, %v1308_v36 }
  0xae   :  { %v1404_v48 = vadd.f32 %v213_v44, %v160_v41  ;;  %v1406_v49 = vadd.f32 %v213_v44, %v161_v42  ;;  %427 = vperm.xlu2 %1102, %v1165_v3   ;;  %v1409_v50 = vadd.f32 %v208_v45, %v158_v1  ;;  %v1411_v51 = vadd.f32 %v208_v45, %v159_v5  ;;  %v294_v54 = vpop.permute.xlu2 %293 }
  0xaf   :  { %v362_v35 = vmul.f32 %v1393_v38, %v294_v54  ;;  %v363_v56 = vmul.f32 %v1395_v39, %v294_v54  ;;  %v166_v3 = vmul.f32 %v1328_v46, %v1348_v62 }
  0xb1   :  { %v1415_v55 = vadd.f32 %v362_v35, %v260_v12  ;;  %v1417_v57 = vadd.f32 %v363_v56, %v261_v4  ;;  %v616_v56 = vld [vmem:[%s1853_s4 + $0x40] sm:$0xff] }
  0xb3   :  { %1858 = vst [vmem:[#allocation3_spill] sm:$0xff] %v1415_v55 }
  0xb4   :  { %1859 = vst [vmem:[#allocation4_spill] sm:$0xff] %v1417_v57 }
  0xb5   :  { %v228_v63 = vpop.permute.xlu1 %227  ;;  %v223_v13 = vpop.permute.xlu0 %222  ;;  %1105 = vset.pattern.permute.xlu1 %v1107_v0 }
  0xb6   :  { %v1428_v14 = vadd.f32 %v228_v63, %v166_v3  ;;  %v1430_v7 = vadd.f32 %v228_v63, %v167_v61  ;;  %v1432_v10 = vadd.f32 %v223_v13, %v164_v6  ;;  %v1434_v19 = vadd.f32 %v223_v13, %v165_v58  ;;  %v306_v20 = vpop.permute.xlu2 %305  ;;  %1106 = vset.pattern.permute.xlu2 %v1107_v0  ;;  %v608_v0 = vld [vmem:[%s1853_s4] sm:$0xff]  ;;  %v617_v6 = vld [vmem:[%s1853_s4 + $0x48] sm:$0xff] }
  0xb7   :  { %v368_v36 = vmul.f32 %v1393_v38, %v306_v20  ;;  %v369_v21 = vmul.f32 %v1395_v39, %v306_v20  ;;  %631 = vperm.xlu1 %1105, %v609_v25   ;;  %626 = vperm.xlu0 %1104, %v608_v0   ;;  %v620_v3 = vld [vmem:[%s1853_s4 + $0x60] sm:$0xff] }
  0xb8   :  { %v612_v20 = vld [vmem:[%s1853_s4 + $0x20] sm:$0xff] }
  0xb9   :  { %v1439_v62 = vadd.f32 %v368_v36, %v266_v31  ;;  %v1441_v23 = vadd.f32 %v369_v21, %v267_v32  ;;  %v622_v36 = vld [vmem:[%s1853_s4 + $0x70] sm:$0xff]  ;;  %v623_v21 = vld [vmem:[%s1853_s4 + $0x78] sm:$0xff] }
  0xbd   :  { %v1443_v12 = vpop.permute.xlu1 %242  ;;  %v1445_v4 = vpop.permute.xlu0 %237 }
  0xbe   :  { %v1450_v26 = vpop.permute.xlu2 %313 }
  0xbf   :  { %641 = vperm.xlu1 %1105, %v611_v8   ;;  %651 = vperm.xlu0 %1104, %v613_v30   ;;  %v615_v30 = vld [vmem:[%s1853_s4 + $0x38] sm:$0xff] }
  0xc5   :  { %v1455_v27 = vpop.permute.xlu1 %257  ;;  %v1457_v28 = vpop.permute.xlu0 %252 }
  0xc6   :  { %v1465_v31 = vpop.permute.xlu2 %325 }
  0xc7   :  { %656 = vperm.xlu1 %1105, %v614_v33   ;;  %666 = vperm.xlu0 %1104, %v616_v56   ;;  %v868_v33 = vld [vmem:[%s1854_s5 + $0x10] sm:$0xff]  ;;  %v1539_v56 = vmul.f32 %v1330_v47, %v1313_v37 }
  0xce   :  { %v302_v32 = vpop.permute.xlu1 %301 }
  0xcf   :  { %v366_v34 = vmul.f32 %v1393_v38, %v302_v32  ;;  %v367_v1 = vmul.f32 %v1395_v39, %v302_v32  ;;  %v298_v5 = vpop.permute.xlu0 %297  ;;  %671 = vperm.xlu1 %1105, %v617_v6   ;;  %v867_v32 = vld [vmem:[%s1854_s5 + $0x8] sm:$0xff]  ;;  %v618_v6 = vld [vmem:[%s1853_s4 + $0x50] sm:$0xff] }
  0xd0   :  { %v364_v41 = vmul.f32 %v1393_v38, %v298_v5  ;;  %v365_v42 = vmul.f32 %v1395_v39, %v298_v5  ;;  %v491_v5 = vperm.slane %v1319_v40, 6 }
  0xd1   :  { %v1475_v44 = vadd.f32 %v366_v34, %v1386_v9  ;;  %v1478_v45 = vadd.f32 %v367_v1, %v1388_v2  ;;  %v1492_v9 = vpop.permute.xlu2 %337  ;;  %v490_v34 = vperm.slane %v1319_v40, 2  ;;  %v174_v40 = vmul.f32 %v1328_v46, %v1359_v18 }
  0xd2   :  { %v1481_v54 = vadd.f32 %v364_v41, %v1334_v52  ;;  %v1484_v35 = vadd.f32 %v365_v42, %v1336_v53  ;;  %v610_v52 = vld [vmem:[%s1853_s4 + $0x10] sm:$0xff]  ;;  %v619_v53 = vld [vmem:[%s1853_s4 + $0x58] sm:$0xff]  ;;  %v170_v42 = vmul.f32 %v1328_v46, %v1313_v37  ;;  %v175_v37 = vmul.f32 %v1330_v47, %v1359_v18 }
  0xd3   :  { %1860 = vst [vmem:[#allocation5_spill] sm:$0xff] %v1475_v44  ;;  %636 = vperm.xlu2 %1106, %v610_v52   ;;  %681 = vperm.xlu0 %1104, %v619_v53   ;;  %v176_v52 = vmul.f32 %v1328_v46, %v1325_v43  ;;  %v177_v53 = vmul.f32 %v1330_v47, %v1325_v43  ;;  %v870_v43 = vld [vmem:[%s1854_s5 + $0x20] sm:$0xff] }
  0xd4   :  { %1861 = vst [vmem:[#allocation6_spill] sm:$0xff] %v1478_v45  ;;  %v286_v57 = vadd.f32 %v1382_v29, %v174_v40 }
  0xd5   :  { %1862 = vst [vmem:[#allocation7_spill] sm:$0xff] %v1481_v54  ;;  %v288_v55 = vadd.f32 %v1457_v28, %v176_v52  ;;  %v289_v45 = vadd.f32 %v1457_v28, %v177_v53  ;;  %v287_v28 = vadd.f32 %v1382_v29, %v175_v37  ;;  %v873_v29 = vld [vmem:[%s1854_s5 + $0x38] sm:$0xff] }
  0xd6   :  { %1863 = vst [vmem:[#allocation8_spill] sm:$0xff] %v1484_v35  ;;  %v1494_v58 = vpop.permute.xlu1 %309 }
  0xd7   :  { %v1496_v2 = vpop.permute.xlu0 %317  ;;  %686 = vperm.xlu1 %1105, %v620_v3   ;;  %v1550_v3 = vperm.slane %v490_v34, 2 }
  0xd9   :  { %v350_v63 = vpop.permute.xlu2 %349 }
  0xdb   :  { %646 = vperm.xlu2 %1106, %v612_v20   ;;  %696 = vperm.xlu0 %1104, %v622_v36   ;;  %v172_v20 = vmul.f32 %v1328_v46, %v1361_v15  ;;  %v390_v36 = vmul.f32 %v1393_v38, %v350_v63 }
  0xdd   :  { %v422_v44 = vadd.f32 %v390_v36, %v288_v55 }
  0xde   :  { %v1507_v61 = vpop.permute.xlu1 %321 }
  0xdf   :  { %v1509_v13 = vpop.permute.xlu0 %329  ;;  %701 = vperm.xlu1 %1105, %v623_v21   ;;  %v1557_v21 = vperm.slane %v491_v5, 2  ;;  %v871_v5 = vld [vmem:[%s1854_s5 + $0x28] sm:$0xff] }
  0xe1   :  { %v484_v8 = vpop.permute.xlu2 %483 }
  0xe3   :  { %661 = vperm.xlu2 %1106, %v615_v30   ;;  %889 = vperm.xlu0 %1104, %v867_v32   ;;  %v178_v32 = vmul.f32 %v1328_v46, %v1374_v24  ;;  %v391_v46 = vmul.f32 %v1395_v39, %v350_v63 }
  0xe5   :  { %v423_v55 = vadd.f32 %v391_v46, %v289_v45  ;;  %v282_v46 = vadd.f32 %v1445_v4, %v170_v42 }
  0xe6   :  { %v1520_v25 = vpop.permute.xlu1 %333 }
  0xe7   :  { %v1522_v0 = vpop.permute.xlu0 %341  ;;  %894 = vperm.xlu1 %1105, %v868_v33   ;;  %v179_v33 = vmul.f32 %v1330_v47, %v1374_v24  ;;  %v290_v24 = vadd.f32 %v1455_v27, %v178_v32 }
  0xe8   :  { %v387_v45 = vmul.f32 %v1395_v39, %v1522_v0 }
  0xe9   :  { %v472_v30 = vpop.permute.xlu2 %471  ;;  %v291_v35 = vadd.f32 %v1455_v27, %v179_v33  ;;  %v621_v33 = vld [vmem:[%s1853_s4 + $0x68] sm:$0xff] }
  0xea   :  { %v519_v42 = vmul.f32 %v1557_v21, %v472_v30 }
  0xeb   :  { %676 = vperm.xlu2 %1106, %v618_v6   ;;  %v173_v6 = vmul.f32 %v1330_v47, %v1361_v15  ;;  %904 = vperm.xlu0 %1104, %v870_v43   ;;  %v525_v47 = vmul.f32 %v1557_v21, %v484_v8 }
  0xee   :  { %v346_v1 = vpop.permute.xlu1 %345 }
  0xef   :  { %v354_v41 = vpop.permute.xlu0 %353  ;;  %v388_v54 = vmul.f32 %v1393_v38, %v346_v1  ;;  %v389_v15 = vmul.f32 %v1395_v39, %v346_v1  ;;  %909 = vperm.xlu1 %1105, %v871_v5   ;;  %v386_v5 = vmul.f32 %v1393_v38, %v1522_v0  ;;  %v518_v0 = vmul.f32 %v1550_v3, %v472_v30  ;;  %v874_v30 = vld [vmem:[%s1854_s5 + $0x40] sm:$0xff] }
  0xf0   :  { %v392_v18 = vmul.f32 %v1393_v38, %v354_v41  ;;  %v393_v34 = vmul.f32 %v1395_v39, %v354_v41  ;;  %v524_v41 = vmul.f32 %v1550_v3, %v484_v8 }
  0xf1   :  { %v420_v53 = vadd.f32 %v388_v54, %v286_v57 }
  0xf2   :  { %v424_v52 = vadd.f32 %v392_v18, %v290_v24  ;;  %v425_v63 = vadd.f32 %v393_v34, %v291_v35  ;;  %v556_v35 = vadd.f32 %v524_v41, %v422_v44  ;;  %v384_v34 = vmul.f32 %v1393_v38, %v1492_v9 }
  0xf3   :  { %691 = vperm.xlu2 %1106, %v621_v33   ;;  %v421_v24 = vadd.f32 %v389_v15, %v287_v28  ;;  %v284_v44 = vadd.f32 %v1443_v12, %v172_v20  ;;  %v385_v41 = vmul.f32 %v1395_v39, %v1492_v9  ;;  %919 = vperm.xlu0 %1104, %v873_v29  }
  0xf5   :  { %v418_v20 = vadd.f32 %v386_v5, %v284_v44 }
  0xf7   :  { %v488_v40 = vpop.permute.xlu1 %487  ;;  %924 = vperm.xlu1 %1105, %v874_v30  }
  0xf8   :  { %v526_v43 = vmul.f32 %v1550_v3, %v488_v40  ;;  %v527_v32 = vmul.f32 %v1557_v21, %v488_v40  ;;  %v480_v27 = vpop.permute.xlu0 %479  ;;  %v557_v40 = vadd.f32 %v525_v47, %v423_v55  ;;  %v285_v47 = vadd.f32 %v1443_v12, %v173_v6 }
  0xf9   :  { %v522_v8 = vmul.f32 %v1550_v3, %v480_v27  ;;  %v523_v1 = vmul.f32 %v1557_v21, %v480_v27  ;;  %v380_v6 = vmul.f32 %v1393_v38, %v1509_v13 }
  0xfa   :  { %v558_v36 = vadd.f32 %v526_v43, %v424_v52  ;;  %v559_v18 = vadd.f32 %v527_v32, %v425_v63  ;;  %v464_v52 = vpop.permute.xlu2 %463  ;;  %v283_v63 = vadd.f32 %v1445_v4, %v1539_v56  ;;  %v588_v43 = vmax.f32 %v556_v35, 0.0 }
  0xfb   :  { %v554_v37 = vadd.f32 %v522_v8, %v420_v53  ;;  %v555_v15 = vadd.f32 %v523_v1, %v421_v24  ;;  %v416_v32 = vadd.f32 %v384_v34, %v282_v46  ;;  %v589_v27 = vmax.f32 %v557_v40, 0.0  ;;  %v876_v24 = vld [vmem:[%s1854_s5 + $0x50] sm:$0xff] }
  0xfc   :  { %v590_v57 = vmax.f32 %v558_v36, 0.0  ;;  %v591_v54 = vmax.f32 %v559_v18, 0.0  ;;  %v419_v33 = vadd.f32 %v387_v45, %v285_v47  ;;  %v417_v56 = vadd.f32 %v385_v41, %v283_v63  ;;  %v866_v18 = vld [vmem:[%s1854_s5] sm:$0xff]  ;;  %934 = vperm.xlu0 %1104, %v876_v24  }
  0xfd   :  { %v586_v4 = vmax.f32 %v554_v37, 0.0  ;;  %v587_v8 = vmax.f32 %v555_v15, 0.0  ;;  %v550_v36 = vadd.f32 %v518_v0, %v416_v32  ;;  %v382_v35 = vmul.f32 %v1393_v38, %v1520_v25  ;;  %884 = vperm.xlu2 %1106, %v866_v18  }
  0xfe   :  { %704 = vmatpush.msra.mxu0 %v590_v57  ;;  %1060 = vmatpush.msra.mxu2 %v590_v57  ;;  %v383_v34 = vmul.f32 %v1395_v39, %v1520_v25  ;;  %v551_v5 = vadd.f32 %v519_v42, %v417_v56  ;;  %v372_v45 = vmul.f32 %v1393_v38, %v1450_v26 }
  0xff   :  { %769 = vmatpush.msra.mxu1 %v591_v54  ;;  %1076 = vmatpush.msra.mxu3 %v591_v54  ;;  %v476_v9 = vpop.permute.xlu1 %475  ;;  %v378_v57 = vmul.f32 %v1393_v38, %v1465_v31  ;;  %v381_v25 = vmul.f32 %v1395_v39, %v1509_v13  ;;  %v379_v54 = vmul.f32 %v1395_v39, %v1465_v31  ;;  %v582_v46 = vmax.f32 %v550_v36, 0.0 }
 0x100   :  { %v520_v28 = vmul.f32 %v1550_v3, %v476_v9  ;;  %v521_v12 = vmul.f32 %v1557_v21, %v476_v9  ;;  %705 = vmatpush.msra.mxu0 %v588_v43  ;;  %1061 = vmatpush.msra.mxu2 %v588_v43  ;;  %v460_v55 = vpop.permute.xlu0 %459  ;;  %v412_v37 = vadd.f32 %v380_v6, %v1428_v14  ;;  %v583_v0 = vmax.f32 %v551_v5, 0.0  ;;  %v879_v6 = vld [vmem:[%s1854_s5 + $0x68] sm:$0xff] }
 0x101   :  { %770 = vmatpush.msra.mxu1 %v589_v27  ;;  %1077 = vmatpush.msra.mxu3 %v589_v27  ;;  %v514_v44 = vmul.f32 %v1550_v3, %v464_v52  ;;  %v414_v41 = vadd.f32 %v382_v35, %v1369_v22  ;;  %v415_v15 = vadd.f32 %v383_v34, %v1371_v11 }
 0x102   :  { %706 = vmatpush.msra.mxu0 %v586_v4  ;;  %v552_v1 = vadd.f32 %v520_v28, %v418_v20  ;;  %v553_v53 = vadd.f32 %v521_v12, %v419_v33  ;;  %1062 = vmatpush.msra.mxu2 %v586_v4  ;;  %v515_v47 = vmul.f32 %v1557_v21, %v464_v52  ;;  %v452_v63 = vpop.permute.xlu2 %451  ;;  %v877_v20 = vld [vmem:[%s1854_s5 + $0x58] sm:$0xff] }
 0x103   :  { %771 = vmatpush.msra.mxu1 %v587_v8  ;;  %1078 = vmatpush.msra.mxu3 %v587_v8  ;;  %v512_v31 = vmul.f32 %v1550_v3, %v460_v55  ;;  %v410_v32 = vadd.f32 %v378_v57, %v1432_v10  ;;  %v374_v22 = vmul.f32 %v1393_v38, %v1496_v2  ;;  %v869_v10 = vld [vmem:[%s1854_s5 + $0x18] sm:$0xff] }
 0x104   :  { %v584_v40 = vmax.f32 %v552_v1, 0.0  ;;  %v585_v29 = vmax.f32 %v553_v53, 0.0  ;;  %v413_v11 = vadd.f32 %v381_v25, %v1430_v7  ;;  %v513_v52 = vmul.f32 %v1557_v21, %v460_v55  ;;  %939 = vperm.xlu1 %1105, %v877_v20   ;;  %949 = vperm.xlu0 %1104, %v879_v6   ;;  %v1864_v6 = vld [vmem:[#allocation5_spill] sm:$0xff] }
 0x105   :  { %v376_v42 = vmul.f32 %v1393_v38, %v1507_v61  ;;  %v546_v33 = vadd.f32 %v514_v44, %v412_v37  ;;  %v373_v7 = vmul.f32 %v1395_v39, %v1450_v26  ;;  %v411_v28 = vadd.f32 %v379_v54, %v1434_v19  ;;  %899 = vperm.xlu2 %1106, %v869_v10   ;;  %v880_v54 = vld [vmem:[%s1854_s5 + $0x70] sm:$0xff] }
 0x106   :  { %707 = vmatpush.msra.mxu0 %v584_v40  ;;  %1063 = vmatpush.msra.mxu2 %v584_v40  ;;  %v377_v12 = vmul.f32 %v1395_v39, %v1507_v61  ;;  %v547_v56 = vadd.f32 %v515_v47, %v413_v11  ;;  %v404_v55 = vadd.f32 %v372_v45, %v1409_v50  ;;  %v12_v50 = vstv %s1855_s6 }
 0x107   :  { %772 = vmatpush.msra.mxu1 %v585_v29  ;;  %1079 = vmatpush.msra.mxu3 %v585_v29  ;;  %v468_v13 = vpop.permute.xlu1 %467  ;;  %v544_v1 = vadd.f32 %v512_v31, %v410_v32  ;;  %v375_v26 = vmul.f32 %v1395_v39, %v1496_v2  ;;  %v406_v19 = vadd.f32 %v374_v22, %v1404_v48  ;;  %v578_v18 = vmax.f32 %v546_v33, 0.0 }
 0x108   :  { %v516_v14 = vmul.f32 %v1550_v3, %v468_v13  ;;  %v517_v43 = vmul.f32 %v1557_v21, %v468_v13  ;;  %708 = vmatpush.msra.mxu0 %v582_v46  ;;  %1064 = vmatpush.msra.mxu2 %v582_v46  ;;  %v448_v4 = vpop.permute.xlu0 %447  ;;  %v545_v53 = vadd.f32 %v513_v52, %v411_v28  ;;  %v579_v34 = vmax.f32 %v547_v56, 0.0 }
 0x109   :  { %773 = vmatpush.msra.mxu1 %v583_v0  ;;  %1080 = vmatpush.msra.mxu3 %v583_v0  ;;  %v408_v61 = vadd.f32 %v376_v42, %v1354_v16  ;;  %v508_v36 = vmul.f32 %v1550_v3, %v452_v63  ;;  %v409_v35 = vadd.f32 %v377_v12, %v1356_v17  ;;  %v576_v40 = vmax.f32 %v544_v1, 0.0 }
 0x10a   :  { %v548_v9 = vadd.f32 %v516_v14, %v414_v41  ;;  %v549_v27 = vadd.f32 %v517_v43, %v415_v15  ;;  %v509_v2 = vmul.f32 %v1557_v21, %v452_v63  ;;  %13 = vst [vmem:[#allocation2] sm:$0x1] %v12_v50  ;;  %v506_v16 = vmul.f32 %v1550_v3, %v448_v4  ;;  %v440_v45 = vpop.permute.xlu2 %439  ;;  %v1866_v50 = vld [vmem:[#allocation7_spill] sm:$0xff] }
 0x10b   :  { %v405_v29 = vadd.f32 %v373_v7, %v1411_v51  ;;  %v407_v17 = vadd.f32 %v375_v26, %v1406_v49  ;;  %v507_v57 = vmul.f32 %v1557_v21, %v448_v4  ;;  %v577_v25 = vmax.f32 %v545_v53, 0.0  ;;  %v872_v51 = vld [vmem:[%s1854_s5 + $0x30] sm:$0xff]  ;;  %v875_v7 = vld [vmem:[%s1854_s5 + $0x48] sm:$0xff] }
 0x10c   :  { %v580_v8 = vmax.f32 %v548_v9, 0.0  ;;  %v581_v30 = vmax.f32 %v549_v27, 0.0  ;;  %v540_v46 = vadd.f32 %v508_v36, %v406_v19  ;;  %v370_v49 = vmul.f32 %v1393_v38, %v1494_v58  ;;  %954 = vperm.xlu1 %1105, %v880_v54   ;;  %v593_v54 = vld [vmem:[%s1856_s3 + $0x8] sm:$0xff] }
 0x10d   :  { %v371_v41 = vmul.f32 %v1395_v39, %v1494_v58  ;;  %v541_v15 = vadd.f32 %v509_v2, %v407_v17  ;;  %v538_v13 = vadd.f32 %v506_v16, %v404_v55  ;;  %v539_v31 = vadd.f32 %v507_v57, %v405_v29  ;;  %914 = vperm.xlu2 %1106, %v872_v51   ;;  %v1867_v2 = vld [vmem:[#allocation8_spill] sm:$0xff]  ;;  %v600_v57 = vld [vmem:[%s1856_s3 + $0x40] sm:$0xff]  ;;  %v595_v51 = vld [vmem:[%s1856_s3 + $0x18] sm:$0xff] }
 0x10e   :  { %709 = vmatpush.msra.mxu0 %v580_v8  ;;  %1065 = vmatpush.msra.mxu2 %v580_v8  ;;  %v502_v14 = vmul.f32 %v1550_v3, %v440_v45  ;;  %v572_v43 = vmax.f32 %v540_v46, 0.0  ;;  %v402_v38 = vadd.f32 %v370_v49, %v1343_v59  ;;  %v503_v39 = vmul.f32 %v1557_v21, %v440_v45  ;;  %v1865_v8 = vld [vmem:[#allocation6_spill] sm:$0xff]  ;;  %v602_v46 = vld [vmem:[%s1856_s3 + $0x50] sm:$0xff] }
 0x10f   :  { %774 = vmatpush.msra.mxu1 %v581_v30  ;;  %1081 = vmatpush.msra.mxu3 %v581_v30  ;;  %v456_v48 = vpop.permute.xlu1 %455  ;;  %v403_v32 = vadd.f32 %v371_v41, %v1345_v60  ;;  %v573_v22 = vmax.f32 %v541_v15, 0.0  ;;  %v570_v42 = vmax.f32 %v538_v13, 0.0  ;;  %v571_v59 = vmax.f32 %v539_v31, 0.0  ;;  %v592_v45 = vld [vmem:[%s1856_s3] sm:$0xff]  ;;  %v603_v49 = vld [vmem:[%s1856_s3 + $0x58] sm:$0xff]  ;;  %v598_v13 = vld [vmem:[%s1856_s3 + $0x30] sm:$0xff] }
 0x110   :  { %v510_v5 = vmul.f32 %v1550_v3, %v456_v48  ;;  %v511_v24 = vmul.f32 %v1557_v21, %v456_v48  ;;  %710 = vmatpush.msra.mxu0 %v578_v18  ;;  %1066 = vmatpush.msra.mxu2 %v578_v18  ;;  %v436_v0 = vpop.permute.xlu0 %435  ;;  %v534_v10 = vadd.f32 %v502_v14, %v1439_v62  ;;  %v596_v41 = vld [vmem:[%s1856_s3 + $0x20] sm:$0xff]  ;;  %v599_v31 = vld [vmem:[%s1856_s3 + $0x38] sm:$0xff] }
 0x111   :  { %775 = vmatpush.msra.mxu1 %v579_v34  ;;  %1082 = vmatpush.msra.mxu3 %v579_v34  ;;  %v500_v11 = vmul.f32 %v1550_v3, %v436_v0  ;;  %v501_v9 = vmul.f32 %v1557_v21, %v436_v0  ;;  %v1036_v60 = vld [vmem:[#allocation2] sm:$0x1]  ;;  %v535_v12 = vadd.f32 %v503_v39, %v1441_v23  ;;  %v1868_v34 = vld [vmem:[#allocation3_spill] sm:$0xff]  ;;  %v606_v0 = vld [vmem:[%s1856_s3 + $0x70] sm:$0xff] }
 0x112   :  { %711 = vmatpush.msra.mxu0 %v576_v40  ;;  %1067 = vmatpush.msra.mxu2 %v576_v40  ;;  %v542_v37 = vadd.f32 %v510_v5, %v408_v61  ;;  %v543_v44 = vadd.f32 %v511_v24, %v409_v35  ;;  %v428_v28 = vpop.permute.xlu2 %427  ;;  %v566_v62 = vmax.f32 %v534_v10, 0.0  ;;  %v604_v15 = vld [vmem:[%s1856_s3 + $0x60] sm:$0xff]  ;;  %v607_v14 = vld [vmem:[%s1856_s3 + $0x78] sm:$0xff] }
 0x113   :  { %776 = vmatpush.msra.mxu1 %v577_v25  ;;  %1083 = vmatpush.msra.mxu3 %v577_v25  ;;  %v532_v55 = vadd.f32 %v500_v11, %v1864_v6  ;;  %v533_v30 = vadd.f32 %v501_v9, %v1865_v8  ;;  %v496_v1 = vmul.f32 %v1550_v3, %v428_v28  ;;  %v567_v53 = vmax.f32 %v535_v12, 0.0  ;;  %v881_v25 = vld [vmem:[%s1854_s5 + $0x78] sm:$0xff] }
 0x114   :  { %v574_v47 = vmax.f32 %v542_v37, 0.0  ;;  %v575_v63 = vmax.f32 %v543_v44, 0.0  ;;  %1039 = vperm.xlu0 %1104, %v1036_v60   ;;  %v497_v26 = vmul.f32 %v1557_v21, %v428_v28  ;;  %v601_v37 = vld [vmem:[%s1856_s3 + $0x48] sm:$0xff]  ;;  %v594_v44 = vld [vmem:[%s1856_s3 + $0x10] sm:$0xff] }
 0x115   :  { %929 = vperm.xlu2 %1106, %v875_v7   ;;  %v564_v36 = vmax.f32 %v532_v55, 0.0  ;;  %v565_v18 = vmax.f32 %v533_v30, 0.0  ;;  %v528_v16 = vadd.f32 %v496_v1, %v1868_v34 }
 0x116   :  { %712 = vmatpush.msra.mxu0 %v574_v47  ;;  %1068 = vmatpush.msra.mxu2 %v574_v47  ;;  %v597_v47 = vld [vmem:[%s1856_s3 + $0x28] sm:$0xff] }
 0x117   :  { %777 = vmatpush.msra.mxu1 %v575_v63  ;;  %1084 = vmatpush.msra.mxu3 %v575_v63  ;;  %v444_v58 = vpop.permute.xlu1 %443  ;;  %v560_v29 = vmax.f32 %v528_v16, 0.0  ;;  %v605_v63 = vld [vmem:[%s1856_s3 + $0x68] sm:$0xff] }
 0x118   :  { %v504_v52 = vmul.f32 %v1550_v3, %v444_v58  ;;  %v505_v20 = vmul.f32 %v1557_v21, %v444_v58  ;;  %713 = vmatpush.msra.mxu0 %v572_v43  ;;  %1069 = vmatpush.msra.mxu2 %v572_v43 }
 0x119   :  { %778 = vmatpush.msra.mxu1 %v573_v22  ;;  %1085 = vmatpush.msra.mxu3 %v573_v22 }
 0x11a   :  { %714 = vmatpush.msra.mxu0 %v570_v42  ;;  %1070 = vmatpush.msra.mxu2 %v570_v42  ;;  %v536_v27 = vadd.f32 %v504_v52, %v402_v38  ;;  %v537_v33 = vadd.f32 %v505_v20, %v403_v32 }
 0x11b   :  { %779 = vmatpush.msra.mxu1 %v571_v59  ;;  %1086 = vmatpush.msra.mxu3 %v571_v59 }
 0x11c   :  { %v568_v4 = vmax.f32 %v536_v27, 0.0  ;;  %v569_v56 = vmax.f32 %v537_v33, 0.0 }
 0x11e   :  { %715 = vmatpush.msra.mxu0 %v568_v4  ;;  %1071 = vmatpush.msra.mxu2 %v568_v4 }
 0x11f   :  { %780 = vmatpush.msra.mxu1 %v569_v56  ;;  %1087 = vmatpush.msra.mxu3 %v569_v56  ;;  %v432_v19 = vpop.permute.xlu1 %431 }
 0x120   :  { %v498_v23 = vmul.f32 %v1550_v3, %v432_v19  ;;  %v499_v61 = vmul.f32 %v1557_v21, %v432_v19  ;;  %716 = vmatpush.msra.mxu0 %v566_v62  ;;  %1072 = vmatpush.msra.mxu2 %v566_v62  ;;  %v878_v3 = vld [vmem:[%s1854_s5 + $0x60] sm:$0xff]  ;;  %v1869_v21 = vld [vmem:[#allocation4_spill] sm:$0xff] }
 0x121   :  { %781 = vmatpush.msra.mxu1 %v567_v53  ;;  %1088 = vmatpush.msra.mxu3 %v567_v53  ;;  %v529_v5 = vadd.f32 %v497_v26, %v1869_v21 }
 0x122   :  { %717 = vmatpush.msra.mxu0 %v564_v36  ;;  %1073 = vmatpush.msra.mxu2 %v564_v36  ;;  %v530_v35 = vadd.f32 %v498_v23, %v1866_v50  ;;  %v531_v48 = vadd.f32 %v499_v61, %v1867_v2 }
 0x123   :  { %782 = vmatpush.msra.mxu1 %v565_v18  ;;  %1089 = vmatpush.msra.mxu3 %v565_v18  ;;  %v561_v17 = vmax.f32 %v529_v5, 0.0 }
 0x124   :  { %v562_v24 = vmax.f32 %v530_v35, 0.0  ;;  %v563_v40 = vmax.f32 %v531_v48, 0.0  ;;  %944 = vperm.xlu2 %1106, %v878_v3  }
 0x126   :  { %718 = vmatpush.msra.mxu0 %v562_v24  ;;  %1074 = vmatpush.msra.mxu2 %v562_v24 }
 0x127   :  { %783 = vmatpush.msra.mxu1 %v563_v40  ;;  %1090 = vmatpush.msra.mxu3 %v563_v40 }
 0x128   :  { %719 = vmatpush.msra.mxu0 %v560_v29  ;;  %1075 = vmatpush.msra.mxu2 %v560_v29 }
 0x129   :  { %784 = vmatpush.msra.mxu1 %v561_v17  ;;  %1091 = vmatpush.msra.mxu3 %v561_v17  ;;  %v632_v43 = vpop.permute.xlu1 %631  ;;  %v627_v32 = vpop.permute.xlu0 %626 }
 0x12a   :  { %720 = vmatmul.f32.vlgmr.msra.gmra.mxu0 %v592_v45  ;;  %744 = vmatmul.f32.vlgmr.msra.gmra.mxu2 %v600_v57 }
 0x12b   :  { %785 = vmatmul.f32.vlgmr.msra.gmra.mxu1 %v592_v45  ;;  %809 = vmatmul.f32.vlgmr.msra.gmra.mxu3 %v600_v57 }
 0x12c   :  { %959 = vperm.xlu2 %1106, %v881_v25  }
 0x12d   :  { %v637_v38 = vpop.permute.xlu2 %636 }
 0x131   :  { %v642_v39 = vpop.permute.xlu1 %641  ;;  %v1767_v22 = vpop.permute.xlu0 %651 }
 0x132   :  { %723 = vmatmul.f32.gmra.mxu0 %v593_v54  ;;  %747 = vmatmul.f32.gmra.mxu2 %v601_v37 }
 0x133   :  { %788 = vmatmul.f32.gmra.mxu1 %v593_v54  ;;  %812 = vmatmul.f32.gmra.mxu3 %v601_v37 }
 0x135   :  { %v647_v58 = vpop.permute.xlu2 %646 }
 0x139   :  { %v1769_v11 = vpop.permute.xlu1 %656  ;;  %v1773_v9 = vpop.permute.xlu0 %666 }
 0x13a   :  { %726 = vmatmul.f32.gmra.mxu0 %v594_v44  ;;  %750 = vmatmul.f32.gmra.mxu2 %v602_v46 }
 0x13b   :  { %791 = vmatmul.f32.gmra.mxu1 %v594_v44  ;;  %815 = vmatmul.f32.gmra.mxu3 %v602_v46 }
 0x13d   :  { %v1771_v52 = vpop.permute.xlu2 %661 }
 0x141   :  { %v1775_v59 = vpop.permute.xlu1 %671 }
 0x142   :  { %729 = vmatmul.f32.gmra.mxu0 %v595_v51  ;;  %753 = vmatmul.f32.gmra.mxu2 %v603_v49 }
 0x143   :  { %794 = vmatmul.f32.gmra.mxu1 %v595_v51  ;;  %818 = vmatmul.f32.gmra.mxu3 %v603_v49 }
 0x145   :  { %v1777_v60 = vpop.permute.xlu2 %676  ;;  %v1783_v28 = vpop.permute.xlu0 %681 }
 0x149   :  { %v1785_v12 = vpop.permute.xlu1 %686 }
 0x14a   :  { %732 = vmatmul.f32.gmra.mxu0 %v596_v41  ;;  %756 = vmatmul.f32.gmra.mxu2 %v604_v15 }
 0x14b   :  { %797 = vmatmul.f32.gmra.mxu1 %v596_v41  ;;  %821 = vmatmul.f32.gmra.mxu3 %v604_v15 }
 0x14d   :  { %v1789_v56 = vpop.permute.xlu2 %691  ;;  %v1793_v30 = vpop.permute.xlu0 %696 }
 0x151   :  { %v1799_v26 = vpop.permute.xlu1 %701 }
 0x152   :  { %735 = vmatmul.f32.gmra.mxu0 %v597_v47  ;;  %759 = vmatmul.f32.gmra.mxu2 %v605_v63 }
 0x153   :  { %800 = vmatmul.f32.gmra.mxu1 %v597_v47  ;;  %824 = vmatmul.f32.gmra.mxu3 %v605_v63 }
 0x155   :  { %v890_v18 = vpop.permute.xlu0 %889 }
 0x157   :  { %v885_v53 = vpop.permute.xlu2 %884 }
 0x159   :  { %v895_v2 = vpop.permute.xlu1 %894 }
 0x15a   :  { %738 = vmatmul.f32.gmra.mxu0 %v598_v13  ;;  %762 = vmatmul.f32.gmra.mxu2 %v606_v0 }
 0x15b   :  { %803 = vmatmul.f32.gmra.mxu1 %v598_v13  ;;  %827 = vmatmul.f32.gmra.mxu3 %v606_v0 }
 0x15d   :  { %v905_v17 = vpop.permute.xlu0 %904 }
 0x15f   :  { %v900_v48 = vpop.permute.xlu2 %899 }
 0x161   :  { %v910_v37 = vpop.permute.xlu1 %909 }
 0x162   :  { %741 = vmatmul.f32.gmra.mxu0 %v599_v31  ;;  %765 = vmatmul.f32.gmra.mxu2 %v607_v14 }
 0x163   :  { %806 = vmatmul.f32.gmra.mxu1 %v599_v31  ;;  %830 = vmatmul.f32.gmra.mxu3 %v607_v14 }
 0x167   :  { %v915_v51 = vpop.permute.xlu2 %914 }
 0x1a7   :  { %v721_v20 = vpop.f32.mrf.mxu0 }
 0x1a8   :  { %v786_v42 = vpop.f32.mrf.mxu1  ;;  %v722_v24 = vadd.f32 %v721_v20, %v627_v32 }
 0x1a9   :  { %v787_v45 = vadd.f32 %v786_v42, %v627_v32 }
 0x1aa   :  { %v834_v49 = vmax.f32 %v722_v24, 0.0  ;;  %v920_v24 = vpop.permute.xlu0 %919 }
 0x1ab   :  { %v835_v47 = vmax.f32 %v787_v45, 0.0 }
 0x1ad   :  { %v1779_v27 = vpop.f32.mrf.mxu2 }
 0x1ae   :  { %v1781_v33 = vpop.f32.mrf.mxu3 }
 0x1af   :  { %v724_v10 = vpop.f32.mrf.mxu0 }
 0x1b0   :  { %v789_v7 = vpop.f32.mrf.mxu1  ;;  %v725_v16 = vadd.f32 %v724_v10, %v632_v43  ;;  %v962_v10 = vmul.f32 %v885_v53, %v834_v49  ;;  %v930_v49 = vpop.permute.xlu2 %929 }
 0x1b1   :  { %v790_v21 = vadd.f32 %v789_v7, %v632_v43 }
 0x1b2   :  { %v836_v25 = vmax.f32 %v725_v16, 0.0 }
 0x1b3   :  { %v837_v44 = vmax.f32 %v790_v21, 0.0 }
 0x1b4   :  { %v964_v31 = vmul.f32 %v890_v18, %v836_v25  ;;  %v925_v25 = vpop.permute.xlu1 %924 }
 0x1b5   :  { %v1787_v4 = vpop.f32.mrf.mxu2 }
 0x1b6   :  { %v1791_v6 = vpop.f32.mrf.mxu3  ;;  %v994_v16 = vadd.f32 %v964_v31, %v962_v10 }
 0x1b7   :  { %v727_v55 = vpop.f32.mrf.mxu0 }
 0x1b8   :  { %v792_v8 = vpop.f32.mrf.mxu1  ;;  %v728_v40 = vadd.f32 %v727_v55, %v637_v38 }
 0x1b9   :  { %v793_v57 = vadd.f32 %v792_v8, %v637_v38  ;;  %v965_v38 = vmul.f32 %v890_v18, %v837_v44 }
 0x1ba   :  { %v838_v41 = vmax.f32 %v728_v40, 0.0 }
 0x1bb   :  { %v839_v63 = vmax.f32 %v793_v57, 0.0 }
 0x1bc   :  { %v966_v7 = vmul.f32 %v895_v2, %v838_v41  ;;  %v811_v41 = vadd.f32 %v1781_v33, %v1773_v9 }
 0x1bd   :  { %v1795_v1 = vpop.f32.mrf.mxu2 }
 0x1be   :  { %v1797_v62 = vpop.f32.mrf.mxu3 }
 0x1bf   :  { %v730_v19 = vpop.f32.mrf.mxu0 }
 0x1c0   :  { %v795_v23 = vpop.f32.mrf.mxu1  ;;  %v731_v54 = vadd.f32 %v730_v19, %v642_v39 }
 0x1c1   :  { %v796_v46 = vadd.f32 %v795_v23, %v642_v39  ;;  %v967_v23 = vmul.f32 %v895_v2, %v839_v63 }
 0x1c2   :  { %v840_v14 = vmax.f32 %v731_v54, 0.0 }
 0x1c3   :  { %v841_v20 = vmax.f32 %v796_v46, 0.0 }
 0x1c4   :  { %v968_v21 = vmul.f32 %v900_v48, %v840_v14 }
 0x1c5   :  { %v1801_v61 = vpop.f32.mrf.mxu2  ;;  %v969_v40 = vmul.f32 %v900_v48, %v841_v20 }
 0x1c6   :  { %v1803_v36 = vpop.f32.mrf.mxu3 }
 0x1c7   :  { %v733_v50 = vpop.f32.mrf.mxu0 }
 0x1c8   :  { %v798_v35 = vpop.f32.mrf.mxu1  ;;  %v734_v15 = vadd.f32 %v733_v50, %v647_v58 }
 0x1c9   :  { %v799_v13 = vadd.f32 %v798_v35, %v647_v58  ;;  %v963_v58 = vmul.f32 %v885_v53, %v835_v47  ;;  %v746_v53 = vadd.f32 %v1779_v27, %v1773_v9  ;;  %v814_v27 = vadd.f32 %v1791_v6, %v1775_v59 }
 0x1ca   :  { %v842_v55 = vmax.f32 %v734_v15, 0.0 }
 0x1cb   :  { %v843_v50 = vmax.f32 %v799_v13, 0.0  ;;  %v1015_v18 = vadd.f32 %v965_v38, %v963_v58  ;;  %v749_v13 = vadd.f32 %v1787_v4, %v1775_v59  ;;  %v850_v33 = vmax.f32 %v746_v53, 0.0  ;;  %v935_v58 = vpop.permute.xlu0 %934 }
 0x1cc   :  { %v851_v4 = vmax.f32 %v811_v41, 0.0  ;;  %v755_v59 = vadd.f32 %v1801_v61, %v1783_v28 }
 0x1cd   :  { %v1805_v34 = vpop.f32.mrf.mxu2  ;;  %v1016_v54 = vadd.f32 %v1015_v18, %v967_v23  ;;  %v971_v44 = vmul.f32 %v905_v17, %v843_v50  ;;  %v820_v23 = vadd.f32 %v1803_v36, %v1783_v28 }
 0x1ce   :  { %v1807_v3 = vpop.f32.mrf.mxu3 }
 0x1cf   :  { %v736_v5 = vpop.f32.mrf.mxu0  ;;  %v1017_v15 = vadd.f32 %v1016_v54, %v969_v40  ;;  %v823_v61 = vadd.f32 %v1807_v3, %v1785_v12 }
 0x1d0   :  { %v801_v29 = vpop.f32.mrf.mxu1  ;;  %v737_v43 = vadd.f32 %v736_v5, %v1767_v22 }
 0x1d1   :  { %v802_v42 = vadd.f32 %v801_v29, %v1767_v22  ;;  %v995_v22 = vadd.f32 %v994_v16, %v966_v7  ;;  %v970_v29 = vmul.f32 %v905_v17, %v842_v55  ;;  %v1018_v20 = vadd.f32 %v1017_v15, %v971_v44 }
 0x1d2   :  { %v844_v5 = vmax.f32 %v737_v43, 0.0  ;;  %v817_v7 = vadd.f32 %v1797_v62, %v1777_v60 }
 0x1d3   :  { %v845_v45 = vmax.f32 %v802_v42, 0.0  ;;  %v996_v2 = vadd.f32 %v995_v22, %v968_v21  ;;  %v940_v21 = vpop.permute.xlu1 %939  ;;  %v856_v22 = vmax.f32 %v755_v59, 0.0 }
 0x1d4   :  { %v855_v18 = vmax.f32 %v817_v7, 0.0 }
 0x1d5   :  { %v1809_v0 = vpop.f32.mrf.mxu2  ;;  %v973_v47 = vmul.f32 %v910_v37, %v845_v45  ;;  %v997_v31 = vadd.f32 %v996_v2, %v970_v29  ;;  %v984_v15 = vmul.f32 %v940_v21, %v856_v22 }
 0x1d6   :  { %v1812_v32 = vpop.f32.mrf.mxu3  ;;  %v761_v28 = vadd.f32 %v1809_v0, %v1789_v56  ;;  %v983_v2 = vmul.f32 %v935_v58, %v855_v18 }
 0x1d7   :  { %v739_v39 = vpop.f32.mrf.mxu0  ;;  %v1019_v55 = vadd.f32 %v1018_v20, %v973_v47 }
 0x1d8   :  { %v740_v8 = vadd.f32 %v739_v39, %v1769_v11  ;;  %v804_v19 = vpop.f32.mrf.mxu1  ;;  %v860_v47 = vmax.f32 %v761_v28, 0.0  ;;  %v1051_v28 = vlaneseq }
 0x1d9   :  { %v805_v35 = vadd.f32 %v804_v19, %v1769_v11  ;;  %v972_v11 = vmul.f32 %v910_v37, %v844_v5  ;;  %v752_v37 = vadd.f32 %v1795_v1, %v1777_v60  ;;  %v852_v19 = vmax.f32 %v749_v13, 0.0 }
 0x1da   :  { %v846_v57 = vmax.f32 %v740_v8, 0.0  ;;  %v758_v60 = vadd.f32 %v1805_v34, %v1785_v12  ;;  %v979_v5 = vmul.f32 %v925_v25, %v851_v4  ;;  %v826_v34 = vadd.f32 %v1812_v32, %v1789_v56 }
 0x1db   :  { %v847_v46 = vmax.f32 %v805_v35, 0.0  ;;  %v998_v39 = vadd.f32 %v997_v31, %v972_v11  ;;  %v978_v35 = vmul.f32 %v925_v25, %v850_v33  ;;  %v854_v16 = vmax.f32 %v752_v37, 0.0  ;;  %v955_v33 = vpop.permute.xlu1 %954 }
 0x1dc   :  { %v974_v14 = vmul.f32 %v915_v51, %v846_v57  ;;  %v980_v45 = vmul.f32 %v930_v49, %v852_v19  ;;  %v857_v57 = vmax.f32 %v820_v23, 0.0  ;;  %v859_v11 = vmax.f32 %v823_v61, 0.0 }
 0x1dd   :  { %v763_v48 = vpop.f32.mrf.mxu2  ;;  %v975_v42 = vmul.f32 %v915_v51, %v847_v46  ;;  %v982_v25 = vmul.f32 %v935_v58, %v854_v16  ;;  %v858_v46 = vmax.f32 %v758_v60, 0.0  ;;  %v861_v56 = vmax.f32 %v826_v34, 0.0 }
 0x1de   :  { %v828_v17 = vpop.f32.mrf.mxu3  ;;  %v999_v6 = vadd.f32 %v998_v39, %v974_v14  ;;  %v764_v53 = vadd.f32 %v763_v48, %v1793_v30  ;;  %v985_v13 = vmul.f32 %v940_v21, %v857_v57  ;;  %vm1053_vm1 = vcmp.lt.s32.totalorder %v1051_v28, 256 }
 0x1df   :  { %v742_v63 = vpop.f32.mrf.mxu0  ;;  %v1020_v1 = vadd.f32 %v1019_v55, %v975_v42  ;;  %v829_v41 = vadd.f32 %v828_v17, %v1793_v30 }
 0x1e0   :  { %v743_v43 = vadd.f32 %v742_v63, %v1771_v52  ;;  %v807_v38 = vpop.f32.mrf.mxu1 }
 0x1e1   :  { %v808_v9 = vadd.f32 %v807_v38, %v1771_v52  ;;  %v853_v52 = vmax.f32 %v814_v27, 0.0  ;;  %v950_v38 = vpop.permute.xlu0 %949  ;;  %v863_v20 = vmax.f32 %v829_v41, 0.0 }
 0x1e2   :  { %v848_v10 = vmax.f32 %v743_v43, 0.0  ;;  %v862_v43 = vmax.f32 %v764_v53, 0.0  ;;  %v989_v37 = vmul.f32 %v950_v38, %v861_v56 }
 0x1e3   :  { %v849_v8 = vmax.f32 %v808_v9, 0.0  ;;  %v981_v29 = vmul.f32 %v930_v49, %v853_v52  ;;  %v988_v9 = vmul.f32 %v950_v38, %v860_v47 }
 0x1e4   :  { %v976_v51 = vmul.f32 %v920_v24, %v848_v10  ;;  %v990_v4 = vmul.f32 %v955_v33, %v862_v43 }
 0x1e5   :  { %v977_v50 = vmul.f32 %v920_v24, %v849_v8  ;;  %v945_v24 = vpop.permute.xlu2 %944  ;;  %v766_v44 = vpop.f32.mrf.mxu2  ;;  %v991_v8 = vmul.f32 %v955_v33, %v863_v20 }
 0x1e6   :  { %v1000_v62 = vadd.f32 %v999_v6, %v976_v51  ;;  %v831_v3 = vpop.f32.mrf.mxu3  ;;  %v767_v63 = vadd.f32 %v766_v44, %v1799_v26  ;;  %v986_v14 = vmul.f32 %v945_v24, %v858_v46  ;;  %v987_v27 = vmul.f32 %v945_v24, %v859_v11 }
 0x1e7   :  { %v1021_v40 = vadd.f32 %v1020_v1, %v977_v50  ;;  %v832_v31 = vadd.f32 %v831_v3, %v1799_v26 }
 0x1e8   :  { %v1001_v36 = vadd.f32 %v1000_v62, %v978_v35  ;;  %v864_v30 = vmax.f32 %v767_v63, 0.0 }
 0x1e9   :  { %v1022_v54 = vadd.f32 %v1021_v40, %v979_v5  ;;  %v865_v39 = vmax.f32 %v832_v31, 0.0  ;;  %v1040_v5 = vpop.permute.xlu0 %1039 }
 0x1ea   :  { %v1002_v12 = vadd.f32 %v1001_v36, %v980_v45  ;;  %v1042_v40 = vperm.slane %v1040_v5, 0 }
 0x1eb   :  { %v1023_v0 = vadd.f32 %v1022_v54, %v981_v29 }
 0x1ec   :  { %v1003_v49 = vadd.f32 %v1002_v12, %v982_v25 }
 0x1ed   :  { %v1024_v32 = vadd.f32 %v1023_v0, %v983_v2  ;;  %v960_v55 = vpop.permute.xlu2 %959 }
 0x1ee   :  { %v1004_v48 = vadd.f32 %v1003_v49, %v984_v15  ;;  %v992_v26 = vmul.f32 %v960_v55, %v864_v30  ;;  %v993_v6 = vmul.f32 %v960_v55, %v865_v39 }
 0x1ef   :  { %v1025_v42 = vadd.f32 %v1024_v32, %v985_v13 }
 0x1f0   :  { %v1005_v17 = vadd.f32 %v1004_v48, %v986_v14 }
 0x1f1   :  { %v1026_v10 = vadd.f32 %v1025_v42, %v987_v27 }
 0x1f2   :  { %v1006_v7 = vadd.f32 %v1005_v17, %v988_v9 }
 0x1f3   :  { %v1027_v19 = vadd.f32 %v1026_v10, %v989_v37 }
 0x1f4   :  { %v1007_v59 = vadd.f32 %v1006_v7, %v990_v4 }
 0x1f5   :  { %v1028_v51 = vadd.f32 %v1027_v19, %v991_v8 }
 0x1f6   :  { %v1008_v58 = vadd.f32 %v1007_v59, %v992_v26 }
 0x1f7   :  { %v1029_v52 = vadd.f32 %v1028_v51, %v993_v6 }
 0x1f8   :  { %v1009_v23 = vrot.slane %v1008_v58, 4 }
 0x1f9   :  { %v1030_v1 = vrot.slane %v1029_v52, 4 }
 0x1fa   :  { %v1010_v50 = vadd.f32 %v1009_v23, %v1008_v58 }
 0x1fb   :  { %v1031_v35 = vadd.f32 %v1030_v1, %v1029_v52 }
 0x1fc   :  { %v1011_v16 = vrot.slane %v1010_v50, 2 }
 0x1fd   :  { %v1032_v60 = vrot.slane %v1031_v35, 2 }
 0x1fe   :  { %v1012_v62 = vadd.f32 %v1011_v16, %v1010_v50 }
 0x1ff   :  { %v1033_v21 = vadd.f32 %v1032_v60, %v1031_v35 }
 0x200   :  { %v1013_v18 = vrot.slane %v1012_v62, 1 }
 0x201   :  { %v1034_v61 = vrot.slane %v1033_v21, 1 }
 0x202   :  { %v1014_v45 = vadd.f32 %v1013_v18, %v1012_v62 }
 0x203   :  { %v1035_v22 = vadd.f32 %v1034_v61, %v1033_v21 }
 0x204   :  { %v1043_v24 = vadd.f32 %v1042_v40, %v1014_v45 }
 0x205   :  { %v1044_v36 = vadd.f32 %v1042_v40, %v1035_v22 }
 0x207   :  { %v1047_v29 = vrot.slane %v1044_v36, 7 }
 0x209   :  { %v1049_v57 = vsel %vm1048_vm0, %v1043_v24, %v1047_v29 }
 0x20a   :  { %1055 = vst.msk [vmem:[%s1857_s7] sm:$0x3] %vm1053_vm1, %v1049_v57 }

</bundles_post_ra>
